<compile_context>
chip_gen: v7x
topology: tpu7x:2x2x1
jax: 0.10.0
libtpu: 0.0.40
codegen_flags: <defaults>
</compile_context>

<pallas_src>
import jax
import jax.numpy as jnp
from jax.experimental import pallas as pl
from jax.experimental.pallas import tpu as pltpu


LANE = 128


def _round_up(x, m):
    return (x + m - 1) // m * m


def _sigmoid(z):
    # tanh goes to the EUP (its own VLIW slot); avoids an f32 divide on VALU.
    return 0.5 * jnp.tanh(0.5 * z) + 0.5


def fnet_kernel(xt_ref, w1_ref, b1_ref, w2_ref, b2_ref, w3_ref, b3_ref, ot_ref):
    xt = xt_ref[...]                                   # (D, TB), batch on lanes

    # Layer 1: (HP, D) @ (D, TB) + (HP, 1) -> (HP, TB)
    z1 = jnp.dot(w1_ref[...], xt, preferred_element_type=jnp.float32) + b1_ref[...]
    h1 = _sigmoid(z1)

    # Layer 2: (HP, HP) @ (HP, TB) + (HP, 1)
    z2 = jnp.dot(w2_ref[...], h1, preferred_element_type=jnp.float32) + b2_ref[...]
    h2 = _sigmoid(z2)

    # Layer 3: (D, HP) @ (HP, TB) + (D, 1) -> (D, TB)
    y = jnp.dot(w3_ref[...], h2, preferred_element_type=jnp.float32) + b3_ref[...]

    # Masked overwrites (same order as the PyTorch in-place assignments;
    # the two conditions are mutually exclusive anyway).
    y = jnp.where(xt < 1e-5, -200.0, y)
    y = jnp.where(xt > 1.0 - 1e-5, 200.0, y)

    ot_ref[...] = y


def _pad_params(params, hidden_pad):
    """PyTorch-layout params -> zero-padded, kernel-ready params.

    Padded rows of W1/b1 and padded COLUMNS of W2/W3 are zero, so the padded
    hidden channels (which hold sigmoid(0)=0.5) never leak into real outputs.
    """
    w1, b1, w2, b2, w3, b3 = params
    H, D = w1.shape
    HP = hidden_pad
    f32 = jnp.float32
    w1p = jnp.zeros((HP, D), f32).at[:H, :].set(w1.astype(f32))
    b1p = jnp.zeros((HP, 1), f32).at[:H, 0].set(b1.astype(f32))
    w2p = jnp.zeros((HP, HP), f32).at[:H, :H].set(w2.astype(f32))
    b2p = jnp.zeros((HP, 1), f32).at[:H, 0].set(b2.astype(f32))
    w3p = jnp.zeros((D, HP), f32).at[:, :H].set(w3.astype(f32))
    b3p = b3.astype(f32).reshape(D, 1)
    return w1p, b1p, w2p, b2p, w3p, b3p


def _choose_batch_tile(batch, d, hp, budget_bytes=12 * 1024 * 1024):
    """Largest lane-multiple batch tile that keeps the pipeline inside a
    conservative (v5e-safe) VMEM budget."""
    # Per batch column: x + y tiles double-buffered (4*D f32 words) plus ~4
    # live (HP, TB) f32 intermediates.
    per_col = (4 * d + 4 * hp) * 4
    tb = (budget_bytes // per_col) // LANE * LANE
    tb = max(LANE, min(tb, 1024))
    # Do not pad a small batch out to a huge tile.
    tb = min(tb, _round_up(batch, LANE))
    return tb


def fnet_forward(x, params):
    """x: (B, D) float32 (same layout as the PyTorch module).
    params: PyTorch-layout (W1 (10,D), b1 (10,), W2 (10,10), b2 (10,),
    W3 (D,10), b3 (D,))."""
    B, D = x.shape
    H = params[0].shape[0]
    HP = _round_up(max(H, LANE), LANE)          # hidden dim padded to 128

    w1p, b1p, w2p, b2p, w3p, b3p = _pad_params(params, HP)

    TB = _choose_batch_tile(B, D, HP)
    B_pad = _round_up(B, TB)

    # Layout plumbing: batch goes on lanes -> present x as (D, B_pad).  In a
    # real pipeline the producer/consumer would keep activations transposed.
    xt = jnp.transpose(x.astype(jnp.float32))                   # (D, B)
    if B_pad != B:
        xt = jnp.pad(xt, ((0, 0), (0, B_pad - B)), constant_values=0.5)

    grid = (B_pad // TB,)
    batch_spec = pl.BlockSpec((D, TB), lambda i: (0, i))
    const = lambda shape: pl.BlockSpec(shape, lambda i: (0, 0))

    # Advisory cost estimate for XLA's scheduler.
    flops = 2 * B_pad * (HP * D + HP * HP + D * HP)
    transcendentals = 2 * B_pad * HP
    bytes_accessed = 4 * (2 * D * B_pad + HP * D + HP * HP + D * HP + 2 * HP + D)

    # VMEM: double-buffered x/y tiles + double-buffered weights + live temps,
    # with 2x headroom (defaults: 16 MiB on v5e, 32 MiB on v6e/v7x).
    tile_bytes = 2 * 2 * D * TB * 4
    weight_bytes = 2 * 4 * (HP * D + HP * HP + D * HP + 2 * HP + D)
    temp_bytes = 4 * HP * TB * 4
    vmem_limit = int(min(max(2 * (tile_bytes + weight_bytes + temp_bytes),
                             8 * 1024 * 1024), 64 * 1024 * 1024))

    yt = pl.pallas_call(
        fnet_kernel,
        out_shape=jax.ShapeDtypeStruct((D, B_pad), jnp.float32),
        grid=grid,
        in_specs=[
            batch_spec,            # x^T tile (D, TB)
            const((HP, D)),        # W1 (padded)
            const((HP, 1)),        # b1 (padded)
            const((HP, HP)),       # W2 (padded)
            const((HP, 1)),        # b2 (padded)
            const((D, HP)),        # W3 (padded)
            const((D, 1)),         # b3
        ],
        out_specs=batch_spec,      # y^T tile (D, TB)
        compiler_params=pltpu.CompilerParams(
            dimension_semantics=("parallel",),
            vmem_limit_bytes=vmem_limit,
        ),
        cost_estimate=pl.CostEstimate(
            flops=flops,
            transcendentals=transcendentals,
            bytes_accessed=bytes_accessed,
        ),
    )(xt, w1p, b1p, w2p, b2p, w3p, b3p)

    return jnp.transpose(yt)[:B]


def init_params(key, in_features, out_features, hidden=10):
    """PyTorch nn.Linear default init: U(-1/sqrt(fan_in), 1/sqrt(fan_in)).
    Weights stored PyTorch-style as (fan_out, fan_in)."""
    D = in_features * out_features
    ks = jax.random.split(key, 6)

    def lin(kw, kb, fan_in, fan_out):
        bound = 1.0 / float(fan_in) ** 0.5
        w = jax.random.uniform(kw, (fan_out, fan_in), jnp.float32, -bound, bound)
        b = jax.random.uniform(kb, (fan_out,), jnp.float32, -bound, bound)
        return w, b

    w1, b1 = lin(ks[0], ks[1], D, hidden)
    w2, b2 = lin(ks[2], ks[3], hidden, hidden)
    w3, b3 = lin(ks[4], ks[5], hidden, D)
    return w1, b1, w2, b2, w3, b3


def reference_forward(x, params):
    """Pure-JAX reference for sanity checking (PyTorch-layout params)."""
    w1, b1, w2, b2, w3, b3 = params
    h1 = jax.nn.sigmoid(x @ w1.T + b1)
    h2 = jax.nn.sigmoid(h1 @ w2.T + b2)
    y = h2 @ w3.T + b3
    y = jnp.where(x < 1e-5, -200.0, y)
    y = jnp.where(x > 1.0 - 1e-5, 200.0, y)
    return y


if __name__ == "__main__":
    key = jax.random.PRNGKey(0)
    k_params, k_x = jax.random.split(key)

    in_features, out_features = 4, 8          # D = in*out = 32, as in FNet(in, out)
    batch = 8
    D = in_features * out_features

    params = init_params(k_params, in_features, out_features)

    x = jax.random.uniform(k_x, (batch, D), jnp.float32, 0.0, 1.0)
    # Force some entries to exercise both masking branches.
    x = x.at[0, 0].set(0.0)          # < 1e-5   -> -200
    x = x.at[1, 1].set(1.0)          # > 1-1e-5 ->  200

    fwd = jax.jit(fnet_forward)
    out = jax.block_until_ready(fwd(x, params))

    ref = reference_forward(x, params)
    assert out.shape == (batch, D)
    assert jnp.allclose(out, ref, atol=1e-4, rtol=1e-4), "mismatch vs reference"

    print("KERNEL_OK")
</pallas_src>

<mosaic_0001>
module attributes {stable_mosaic.version = 11 : i64} {
  func.func @fnet_kernel(%arg0: i32, %arg1: memref<32x128xf32, #tpu.memory_space<vmem>>, %arg2: memref<128x32xf32, #tpu.memory_space<vmem>>, %arg3: memref<128x1xf32, #tpu.memory_space<vmem>>, %arg4: memref<128x128xf32, #tpu.memory_space<vmem>>, %arg5: memref<128x1xf32, #tpu.memory_space<vmem>>, %arg6: memref<32x128xf32, #tpu.memory_space<vmem>>, %arg7: memref<32x1xf32, #tpu.memory_space<vmem>>, %arg8: memref<32x128xf32, #tpu.memory_space<vmem>>) attributes {dimension_semantics = [#tpu.dimension_semantics<parallel>], iteration_bounds = array<i64: 1>, scalar_prefetch = 0 : i64, scratch_operands = 0 : i64, tpu.core_type = #tpu.core_type<tc>, window_params = [{transform_indices = @transform_0, window_bounds = array<i64: 32, 128>}, {pipeline_mode = #tpu.pipeline_mode<synchronous>, transform_indices = @transform_1, window_bounds = array<i64: 128, 32>}, {pipeline_mode = #tpu.pipeline_mode<synchronous>, transform_indices = @transform_2, window_bounds = array<i64: 128, 1>}, {pipeline_mode = #tpu.pipeline_mode<synchronous>, transform_indices = @transform_3, window_bounds = array<i64: 128, 128>}, {pipeline_mode = #tpu.pipeline_mode<synchronous>, transform_indices = @transform_4, window_bounds = array<i64: 128, 1>}, {pipeline_mode = #tpu.pipeline_mode<synchronous>, transform_indices = @transform_5, window_bounds = array<i64: 32, 128>}, {pipeline_mode = #tpu.pipeline_mode<synchronous>, transform_indices = @transform_6, window_bounds = array<i64: 32, 1>}, {transform_indices = @transform_7, window_bounds = array<i64: 32, 128>}]} {
    %c0 = arith.constant 0 : index
    %c0_0 = arith.constant 0 : index
    %0 = vector.load %arg1[%c0, %c0_0] : memref<32x128xf32, #tpu.memory_space<vmem>>, vector<32x128xf32>
    %c0_1 = arith.constant 0 : index
    %c0_2 = arith.constant 0 : index
    %1 = vector.load %arg2[%c0_1, %c0_2] : memref<128x32xf32, #tpu.memory_space<vmem>>, vector<128x32xf32>
    %cst = arith.constant dense<0.000000e+00> : vector<128x128xf32>
    %2 = tpu.matmul %1, %0, %cst {dimension_numbers = #tpu.dot_dimension_numbers<[1], [0], [0], [1], [0, 0, 1, 1], [], []>} : vector<128x32xf32>, vector<32x128xf32>, vector<128x128xf32> -> vector<128x128xf32>
    %c0_3 = arith.constant 0 : index
    %c0_4 = arith.constant 0 : index
    %3 = vector.load %arg3[%c0_3, %c0_4] : memref<128x1xf32, #tpu.memory_space<vmem>>, vector<128x1xf32>
    %4 = vector.broadcast %3 : vector<128x1xf32> to vector<128x128xf32>
    %5 = arith.addf %2, %4 : vector<128x128xf32>
    %cst_5 = arith.constant 5.000000e-01 : f32
    %6 = vector.broadcast %cst_5 : f32 to vector<128x128xf32>
    %7 = arith.mulf %6, %5 : vector<128x128xf32>
    %8 = math.tanh %7 : vector<128x128xf32>
    %cst_6 = arith.constant 5.000000e-01 : f32
    %9 = vector.broadcast %cst_6 : f32 to vector<128x128xf32>
    %10 = arith.mulf %9, %8 : vector<128x128xf32>
    %cst_7 = arith.constant 5.000000e-01 : f32
    %11 = vector.broadcast %cst_7 : f32 to vector<128x128xf32>
    %12 = arith.addf %10, %11 : vector<128x128xf32>
    %c0_8 = arith.constant 0 : index
    %c0_9 = arith.constant 0 : index
    %13 = vector.load %arg4[%c0_8, %c0_9] : memref<128x128xf32, #tpu.memory_space<vmem>>, vector<128x128xf32>
    %cst_10 = arith.constant dense<0.000000e+00> : vector<128x128xf32>
    %14 = tpu.matmul %13, %12, %cst_10 {dimension_numbers = #tpu.dot_dimension_numbers<[1], [0], [0], [1], [0, 0, 1, 1], [], []>} : vector<128x128xf32>, vector<128x128xf32>, vector<128x128xf32> -> vector<128x128xf32>
    %c0_11 = arith.constant 0 : index
    %c0_12 = arith.constant 0 : index
    %15 = vector.load %arg5[%c0_11, %c0_12] : memref<128x1xf32, #tpu.memory_space<vmem>>, vector<128x1xf32>
    %16 = vector.broadcast %15 : vector<128x1xf32> to vector<128x128xf32>
    %17 = arith.addf %14, %16 : vector<128x128xf32>
    %cst_13 = arith.constant 5.000000e-01 : f32
    %18 = vector.broadcast %cst_13 : f32 to vector<128x128xf32>
    %19 = arith.mulf %18, %17 : vector<128x128xf32>
    %20 = math.tanh %19 : vector<128x128xf32>
    %cst_14 = arith.constant 5.000000e-01 : f32
    %21 = vector.broadcast %cst_14 : f32 to vector<128x128xf32>
    %22 = arith.mulf %21, %20 : vector<128x128xf32>
    %cst_15 = arith.constant 5.000000e-01 : f32
    %23 = vector.broadcast %cst_15 : f32 to vector<128x128xf32>
    %24 = arith.addf %22, %23 : vector<128x128xf32>
    %c0_16 = arith.constant 0 : index
    %c0_17 = arith.constant 0 : index
    %25 = vector.load %arg6[%c0_16, %c0_17] : memref<32x128xf32, #tpu.memory_space<vmem>>, vector<32x128xf32>
    %cst_18 = arith.constant dense<0.000000e+00> : vector<32x128xf32>
    %26 = tpu.matmul %25, %24, %cst_18 {dimension_numbers = #tpu.dot_dimension_numbers<[1], [0], [0], [1], [0, 0, 1, 1], [], []>} : vector<32x128xf32>, vector<128x128xf32>, vector<32x128xf32> -> vector<32x128xf32>
    %c0_19 = arith.constant 0 : index
    %c0_20 = arith.constant 0 : index
    %27 = vector.load %arg7[%c0_19, %c0_20] : memref<32x1xf32, #tpu.memory_space<vmem>>, vector<32x1xf32>
    %28 = vector.broadcast %27 : vector<32x1xf32> to vector<32x128xf32>
    %29 = arith.addf %26, %28 : vector<32x128xf32>
    %cst_21 = arith.constant 9.99999974E-6 : f32
    %30 = vector.broadcast %cst_21 : f32 to vector<32x128xf32>
    %31 = arith.cmpf olt, %0, %30 : vector<32x128xf32>
    %cst_22 = arith.constant -2.000000e+02 : f32
    %32 = vector.broadcast %cst_22 : f32 to vector<32x128xf32>
    %33 = arith.select %31, %32, %29 : vector<32x128xi1>, vector<32x128xf32>
    %cst_23 = arith.constant 0.999989986 : f32
    %34 = vector.broadcast %cst_23 : f32 to vector<32x128xf32>
    %35 = arith.cmpf ogt, %0, %34 : vector<32x128xf32>
    %cst_24 = arith.constant 2.000000e+02 : f32
    %36 = vector.broadcast %cst_24 : f32 to vector<32x128xf32>
    %37 = arith.select %35, %36, %33 : vector<32x128xi1>, vector<32x128xf32>
    %c0_25 = arith.constant 0 : index
    %c0_26 = arith.constant 0 : index
    %38 = vector.load %arg8[%c0_25, %c0_26] : memref<32x128xf32, #tpu.memory_space<vmem>>, vector<32x128xf32>
    tpu.vector_store %arg8[%c0_25, %c0_26], %37 {strides = array<i32>} : memref<32x128xf32, #tpu.memory_space<vmem>>, vector<32x128xf32>,
    return
  }
  func.func @transform_0(%arg0: i32) -> (i32, i32) {
    %c0_i32 = arith.constant 0 : i32
    %c0_i32_0 = arith.constant 0 : i32
    return %c0_i32, %arg0 : i32, i32
  }
  func.func @transform_1(%arg0: i32) -> (i32, i32) {
    %c0_i32 = arith.constant 0 : i32
    %c0_i32_0 = arith.constant 0 : i32
    %c0_i32_1 = arith.constant 0 : i32
    return %c0_i32, %c0_i32_0 : i32, i32
  }
  func.func @transform_2(%arg0: i32) -> (i32, i32) {
    %c0_i32 = arith.constant 0 : i32
    %c0_i32_0 = arith.constant 0 : i32
    %c0_i32_1 = arith.constant 0 : i32
    return %c0_i32, %c0_i32_0 : i32, i32
  }
  func.func @transform_3(%arg0: i32) -> (i32, i32) {
    %c0_i32 = arith.constant 0 : i32
    %c0_i32_0 = arith.constant 0 : i32
    %c0_i32_1 = arith.constant 0 : i32
    return %c0_i32, %c0_i32_0 : i32, i32
  }
  func.func @transform_4(%arg0: i32) -> (i32, i32) {
    %c0_i32 = arith.constant 0 : i32
    %c0_i32_0 = arith.constant 0 : i32
    %c0_i32_1 = arith.constant 0 : i32
    return %c0_i32, %c0_i32_0 : i32, i32
  }
  func.func @transform_5(%arg0: i32) -> (i32, i32) {
    %c0_i32 = arith.constant 0 : i32
    %c0_i32_0 = arith.constant 0 : i32
    %c0_i32_1 = arith.constant 0 : i32
    return %c0_i32, %c0_i32_0 : i32, i32
  }
  func.func @transform_6(%arg0: i32) -> (i32, i32) {
    %c0_i32 = arith.constant 0 : i32
    %c0_i32_0 = arith.constant 0 : i32
    %c0_i32_1 = arith.constant 0 : i32
    return %c0_i32, %c0_i32_0 : i32, i32
  }
  func.func @transform_7(%arg0: i32) -> (i32, i32) {
    %c0_i32 = arith.constant 0 : i32
    %c0_i32_0 = arith.constant 0 : i32
    return %c0_i32, %arg0 : i32, i32
  }
}

</mosaic_0001>

<bundles_post_ra>
// kernel: fnet_forward.1
= control target key start
LH: loop header
LB: loop body
LE: loop exit
PB: predicated region body
PF: predicated region fallthrough
CT: control target
= control target key end

     0   :  { %vm142_vm0 = vcmask 261120   ;;  %v1211_v3 = vmov 0   ;;  %s1528_s0 = inlined_call_operand.vmem [shape: f32[32,128], index: 0, kind: input, shape index: {}]   ;;  %s1529_s1 = inlined_call_operand.vmem [shape: f32[128,32], index: 1, kind: input, shape index: {}]   ;;  %s1530_s2 = inlined_call_operand.vmem [shape: f32[128,1], index: 2, kind: input, shape index: {}]   ;;  %s1531_s4 = inlined_call_operand.vmem [shape: f32[128,1], index: 4, kind: input, shape index: {}]   ;;  %s1532_s6 = inlined_call_operand.vmem [shape: f32[32,1], index: 6, kind: input, shape index: {}]   ;;  %s1533_s3 = inlined_call_operand.vmem [shape: f32[128,128], index: 3, kind: input, shape index: {}]   ;;  %s1534_s5 = inlined_call_operand.vmem [shape: f32[32,128], index: 5, kind: input, shape index: {}]   ;;  %s1535_s7 = inlined_call_operand.vmem [shape: f32[32,128], index: 7, kind: output, shape index: {}]  }
   0x1   :  { %v1255_v0 = vld [vmem:[%s1528_s0] sm:$0xff]  ;;  %v1260_v1 = vld [vmem:[%s1528_s0 + $0x8] sm:$0xff]  ;;  %v1265_v2 = vld [vmem:[%s1528_s0 + $0x10] sm:$0xff]  ;;  %1145 = vset.pattern.permute.xlu0 %v1211_v3  ;;  %1146 = vset.pattern.permute.xlu1 %v1211_v3 }
   0x2   :  { %v1072_v4 = vpack.c.bf16 %v1260_v1, %v1255_v0  ;;  %v1272_v5 = vld [vmem:[%s1528_s0 + $0x18] sm:$0xff]  ;;  %v30_v6 = vld [vmem:[%s1529_s1] sm:$0xff]  ;;  %v48_v9 = vld [vmem:[%s1530_s2 + $0x10] sm:$0xff]  ;;  %vm835_vm1 = vcmp.lt.f32.partialorder %v1260_v1, 1e-05 }
   0x3   :  { %v1076_v7 = vpack.c.bf16 %v1272_v5, %v1265_v2  ;;  %954 = vmatprep.mubr.msk.f32.mxu0 %vm142_vm0, %v30_v6  ;;  %v46_v8 = vld [vmem:[%s1530_s2] sm:$0xff]  ;;  %74 = vperm.xlu1 %1146, %v48_v9   ;;  %v47_v10 = vld [vmem:[%s1530_s2 + $0x8] sm:$0xff]  ;;  %v49_v11 = vld [vmem:[%s1530_s2 + $0x18] sm:$0xff]  ;;  %vm843_vm2 = vcmp.gt.f32.partialorder %v1260_v1, 0.99999 }
   0x4   :  { %1073 = vmatprep.subr.bf16.mxu0 %v1072_v4  ;;  %64 = vperm.xlu0 %1145, %v46_v8   ;;  %v31_v12 = vld [vmem:[%s1529_s1 + $0x8] sm:$0xff]  ;;  %v32_v13 = vld [vmem:[%s1529_s1 + $0x10] sm:$0xff]  ;;  %v50_v14 = vld [vmem:[%s1530_s2 + $0x20] sm:$0xff]  ;;  %vm834_vm3 = vcmp.lt.f32.partialorder %v1255_v0, 1e-05 }
   0x5   :  { %1075 = vmatpush3.bf16.msra.mxu0 %v1072_v4  ;;  %v51_v15 = vld [vmem:[%s1530_s2 + $0x28] sm:$0xff]  ;;  %v33_v16 = vld [vmem:[%s1529_s1 + $0x18] sm:$0xff]  ;;  %v34_v17 = vld [vmem:[%s1529_s1 + $0x20] sm:$0xff]  ;;  %vm842_vm4 = vcmp.gt.f32.partialorder %v1255_v0, 0.99999 }
   0x6   :  { %1077 = vmatprep.subr.bf16.mxu0 %v1076_v7  ;;  %v52_v18 = vld [vmem:[%s1530_s2 + $0x30] sm:$0xff]  ;;  %v53_v19 = vld [vmem:[%s1530_s2 + $0x38] sm:$0xff]  ;;  %v35_v20 = vld [vmem:[%s1529_s1 + $0x28] sm:$0xff]  ;;  %vm837_vm5 = vcmp.lt.f32.partialorder %v1272_v5, 1e-05 }
   0x7   :  { %79 = vperm.xlu1 %1146, %v49_v11   ;;  %v36_v21 = vld [vmem:[%s1529_s1 + $0x30] sm:$0xff]  ;;  %v54_v22 = vld [vmem:[%s1530_s2 + $0x40] sm:$0xff]  ;;  %v55_v23 = vld [vmem:[%s1530_s2 + $0x48] sm:$0xff]  ;;  %vm845_vm6 = vcmp.gt.f32.partialorder %v1272_v5, 0.99999 }
   0x8   :  { %69 = vperm.xlu0 %1145, %v47_v10   ;;  %v37_v24 = vld [vmem:[%s1529_s1 + $0x38] sm:$0xff]  ;;  %v38_v25 = vld [vmem:[%s1529_s1 + $0x40] sm:$0xff]  ;;  %v56_v26 = vld [vmem:[%s1530_s2 + $0x50] sm:$0xff]  ;;  %vm836_vm7 = vcmp.lt.f32.partialorder %v1265_v2, 1e-05 }
   0x9   :  { %1079 = vmatpush3.bf16.msra.mxu0 %v1076_v7  ;;  %v57_v27 = vld [vmem:[%s1530_s2 + $0x58] sm:$0xff]  ;;  %v39_v28 = vld [vmem:[%s1529_s1 + $0x48] sm:$0xff]  ;;  %v40_v29 = vld [vmem:[%s1529_s1 + $0x50] sm:$0xff]  ;;  %vm844_vm8 = vcmp.gt.f32.partialorder %v1265_v2, 0.99999 }
   0xa   :  { %v58_v30 = vld [vmem:[%s1530_s2 + $0x60] sm:$0xff]  ;;  %v59_v31 = vld [vmem:[%s1530_s2 + $0x68] sm:$0xff]  ;;  %v41_v32 = vld [vmem:[%s1529_s1 + $0x58] sm:$0xff] }
   0xb   :  { %89 = vperm.xlu1 %1146, %v51_v15   ;;  %v42_v33 = vld [vmem:[%s1529_s1 + $0x60] sm:$0xff]  ;;  %v60_v34 = vld [vmem:[%s1530_s2 + $0x70] sm:$0xff]  ;;  %v61_v35 = vld [vmem:[%s1530_s2 + $0x78] sm:$0xff] }
   0xc   :  { %955 = vmatmul.mubr.msk.f32.vlgmr.msra.gmra.mrb[0].mxu0 %vm142_vm0, %v31_v12  ;;  %84 = vperm.xlu0 %1145, %v50_v14   ;;  %v43_v36 = vld [vmem:[%s1529_s1 + $0x68] sm:$0xff]  ;;  %v44_v37 = vld [vmem:[%s1529_s1 + $0x70] sm:$0xff]  ;;  %v416_v38 = vld [vmem:[%s1531_s4] sm:$0xff] }
   0xd   :  { %957 = vmatprep.mubr.msk.f32.mxu0 %vm142_vm0, %v32_v13  ;;  %v417_v39 = vld [vmem:[%s1531_s4 + $0x8] sm:$0xff]  ;;  %v45_v40 = vld [vmem:[%s1529_s1 + $0x78] sm:$0xff]  ;;  %v418_v41 = vld [vmem:[%s1531_s4 + $0x10] sm:$0xff] }
   0xe   :  { %v419_v42 = vld [vmem:[%s1531_s4 + $0x18] sm:$0xff]  ;;  %v420_v43 = vld [vmem:[%s1531_s4 + $0x20] sm:$0xff]  ;;  %v421_v44 = vld [vmem:[%s1531_s4 + $0x28] sm:$0xff] }
   0xf   :  { %99 = vperm.xlu1 %1146, %v53_v19   ;;  %v422_v45 = vld [vmem:[%s1531_s4 + $0x30] sm:$0xff]  ;;  %v423_v46 = vld [vmem:[%s1531_s4 + $0x38] sm:$0xff]  ;;  %v424_v47 = vld [vmem:[%s1531_s4 + $0x40] sm:$0xff] }
  0x10   :  { %958 = vmatmul.mubr.msk.f32.gmra.mrb[2].mxu0 %vm142_vm0, %v33_v16  ;;  %94 = vperm.xlu0 %1145, %v52_v18   ;;  %v425_v48 = vld [vmem:[%s1531_s4 + $0x48] sm:$0xff]  ;;  %v426_v49 = vld [vmem:[%s1531_s4 + $0x50] sm:$0xff]  ;;  %v427_v50 = vld [vmem:[%s1531_s4 + $0x58] sm:$0xff] }
  0x11   :  { %960 = vmatprep.mubr.msk.f32.mxu0 %vm142_vm0, %v34_v17  ;;  %v428_v51 = vld [vmem:[%s1531_s4 + $0x60] sm:$0xff]  ;;  %v429_v52 = vld [vmem:[%s1531_s4 + $0x68] sm:$0xff]  ;;  %v430_v53 = vld [vmem:[%s1531_s4 + $0x70] sm:$0xff] }
  0x12   :  { %v431_v54 = vld [vmem:[%s1531_s4 + $0x78] sm:$0xff]  ;;  %v725_v55 = vld [vmem:[%s1532_s6] sm:$0xff]  ;;  %v726_v56 = vld [vmem:[%s1532_s6 + $0x8] sm:$0xff] }
  0x13   :  { %109 = vperm.xlu1 %1146, %v55_v23   ;;  %v727_v57 = vld [vmem:[%s1532_s6 + $0x10] sm:$0xff]  ;;  %v728_v58 = vld [vmem:[%s1532_s6 + $0x18] sm:$0xff]  ;;  %v400_v59 = vld [vmem:[%s1533_s3] sm:$0xff] }
  0x14   :  { %961 = vmatmul.mubr.msk.f32.gmra.mrb[4].mxu0 %vm142_vm0, %v35_v20  ;;  %104 = vperm.xlu0 %1145, %v54_v22  }
  0x15   :  { %963 = vmatprep.mubr.msk.f32.mxu0 %vm142_vm0, %v36_v21  ;;  %1010 = vmatprep.mubr.f32.mxu1 %v400_v59 }
  0x17   :  { %119 = vperm.xlu1 %1146, %v57_v27  }
  0x18   :  { %964 = vmatmul.mubr.msk.f32.gmra.mrb[6].mxu0 %vm142_vm0, %v37_v24  ;;  %114 = vperm.xlu0 %1145, %v56_v26  }
  0x19   :  { %966 = vmatprep.mubr.msk.f32.mxu0 %vm142_vm0, %v38_v25 }
  0x1b   :  { %129 = vperm.xlu1 %1146, %v59_v31  }
  0x1c   :  { %967 = vmatmul.mubr.msk.f32.gmra.mrb[8].mxu0 %vm142_vm0, %v39_v28  ;;  %124 = vperm.xlu0 %1145, %v58_v30  }
  0x1d   :  { %969 = vmatprep.mubr.msk.f32.mxu0 %vm142_vm0, %v40_v29 }
  0x1f   :  { %139 = vperm.xlu1 %1146, %v61_v35  }
  0x20   :  { %970 = vmatmul.mubr.msk.f32.gmra.mrb[10].mxu0 %vm142_vm0, %v41_v32  ;;  %134 = vperm.xlu0 %1145, %v60_v34  }
  0x21   :  { %972 = vmatprep.mubr.msk.f32.mxu0 %vm142_vm0, %v42_v33 }
  0x23   :  { %439 = vperm.xlu1 %1146, %v417_v39  }
  0x24   :  { %973 = vmatmul.mubr.msk.f32.gmra.mrb[12].mxu0 %vm142_vm0, %v43_v36  ;;  %434 = vperm.xlu0 %1145, %v416_v38  }
  0x25   :  { %975 = vmatprep.mubr.msk.f32.mxu0 %vm142_vm0, %v44_v37 }
  0x27   :  { %449 = vperm.xlu1 %1146, %v419_v42  }
  0x28   :  { %976 = vmatmul.mubr.msk.f32.gmra.mrb[14].mxu0 %vm142_vm0, %v45_v40  ;;  %444 = vperm.xlu0 %1145, %v418_v41  }
  0x2b   :  { %459 = vperm.xlu1 %1146, %v421_v44  }
  0x2c   :  { %454 = vperm.xlu0 %1145, %v420_v43  }
  0x2f   :  { %469 = vperm.xlu1 %1146, %v423_v46  }
  0x30   :  { %464 = vperm.xlu0 %1145, %v422_v45  }
  0x33   :  { %479 = vperm.xlu1 %1146, %v425_v48  }
  0x34   :  { %474 = vperm.xlu0 %1145, %v424_v47  }
  0x37   :  { %489 = vperm.xlu1 %1146, %v427_v50  }
  0x38   :  { %484 = vperm.xlu0 %1145, %v426_v49  }
  0x3b   :  { %499 = vperm.xlu1 %1146, %v429_v52  }
  0x3c   :  { %494 = vperm.xlu0 %1145, %v428_v51  }
  0x3f   :  { %509 = vperm.xlu1 %1146, %v431_v54  }
  0x40   :  { %504 = vperm.xlu0 %1145, %v430_v53  }
  0x43   :  { %736 = vperm.xlu1 %1146, %v726_v56  }
  0x44   :  { %731 = vperm.xlu0 %1145, %v725_v55  }
  0x47   :  { %746 = vperm.xlu1 %1146, %v728_v58  }
  0x48   :  { %741 = vperm.xlu0 %1145, %v727_v57  }
  0x82   :  { %v75_v60 = vpop.permute.xlu1 %74 }
  0x83   :  { %v65_v61 = vpop.permute.xlu0 %64 }
  0x86   :  { %v80_v62 = vpop.permute.xlu1 %79 }
  0x87   :  { %v70_v63 = vpop.permute.xlu0 %69 }
  0x8a   :  { %v90_v3 = vpop.permute.xlu1 %89 }
  0x8b   :  { %v85_v4 = vpop.permute.xlu0 %84 }
  0x8e   :  { %v100_v11 = vpop.permute.xlu1 %99 }
  0x8f   :  { %v95_v14 = vpop.permute.xlu0 %94 }
  0x92   :  { %v110_v23 = vpop.permute.xlu1 %109 }
  0x93   :  { %v105_v25 = vpop.permute.xlu0 %104 }
  0x96   :  { %v120_v35 = vpop.permute.xlu1 %119 }
  0x97   :  { %v115_v39 = vpop.permute.xlu0 %114 }
  0x9a   :  { %v130_v56 = vpop.permute.xlu1 %129 }
  0xdf   :  { %v956_v6 = vpop.f32.mrb[0].mxu0 }
  0xe0   :  { %v263_v7 = vadd.f32 %v956_v6, %v70_v63  ;;  %v257_v8 = vpop.f32.mrb[1].mxu0 }
  0xe1   :  { %v258_v9 = vadd.f32 %v257_v8, %v65_v61 }
  0xe2   :  { %v337_v10 = vmul.f32 0.5, %v263_v7 }
  0xe3   :  { %v336_v12 = vmul.f32 0.5, %v258_v9  ;;  %v959_v13 = vpop.f32.mrb[2].mxu0 }
  0xe4   :  { %1147 = vtanh.f32 %v337_v10  ;;  %v273_v15 = vadd.f32 %v959_v13, %v80_v62  ;;  %v267_v16 = vpop.f32.mrb[3].mxu0 }
  0xe5   :  { %1149 = vtanh.f32 %v336_v12  ;;  %v268_v17 = vadd.f32 %v267_v16, %v75_v60  ;;  %v125_v60 = vpop.permute.xlu0 %124 }
  0xe6   :  { %v339_v18 = vmul.f32 0.5, %v273_v15 }
  0xe7   :  { %v338_v19 = vmul.f32 0.5, %v268_v17  ;;  %v962_v20 = vpop.f32.mrb[4].mxu0  ;;  %v140_v17 = vpop.permute.xlu1 %139 }
  0xe8   :  { %1151 = vtanh.f32 %v339_v18  ;;  %v283_v21 = vadd.f32 %v962_v20, %v90_v3  ;;  %v277_v22 = vpop.f32.mrb[5].mxu0 }
  0xe9   :  { %1153 = vtanh.f32 %v338_v19  ;;  %v278_v24 = vadd.f32 %v277_v22, %v85_v4 }
  0xea   :  { %v341_v26 = vmul.f32 0.5, %v283_v21  ;;  %v135_v21 = vpop.permute.xlu0 %134 }
  0xeb   :  { %v340_v27 = vmul.f32 0.5, %v278_v24  ;;  %v965_v28 = vpop.f32.mrb[6].mxu0 }
  0xec   :  { %1155 = vtanh.f32 %v341_v26  ;;  %v293_v29 = vadd.f32 %v965_v28, %v100_v11  ;;  %v287_v30 = vpop.f32.mrb[7].mxu0 }
  0xed   :  { %1157 = vtanh.f32 %v340_v27  ;;  %v288_v31 = vadd.f32 %v287_v30, %v95_v14 }
  0xee   :  { %v1148_v32 = vpop.eup %1147  ;;  %v343_v33 = vmul.f32 0.5, %v293_v29 }
  0xef   :  { %v1150_v34 = vpop.eup %1149  ;;  %v342_v36 = vmul.f32 0.5, %v288_v31  ;;  %v968_v37 = vpop.f32.mrb[8].mxu0  ;;  %v369_v38 = vmul.f32 0.5, %v1148_v32 }
  0xf0   :  { %1159 = vtanh.f32 %v343_v33  ;;  %v303_v40 = vadd.f32 %v968_v37, %v110_v23  ;;  %v297_v41 = vpop.f32.mrb[9].mxu0  ;;  %v368_v42 = vmul.f32 0.5, %v1150_v34 }
  0xf1   :  { %1161 = vtanh.f32 %v342_v36  ;;  %v298_v43 = vadd.f32 %v297_v41, %v105_v25  ;;  %v385_v44 = vadd.f32 0.5, %v369_v38 }
  0xf2   :  { %v1152_v45 = vpop.eup %1151  ;;  %v345_v46 = vmul.f32 0.5, %v303_v40  ;;  %v384_v47 = vadd.f32 0.5, %v368_v42 }
  0xf3   :  { %v1154_v48 = vpop.eup %1153  ;;  %v371_v49 = vmul.f32 0.5, %v1152_v45  ;;  %v344_v50 = vmul.f32 0.5, %v298_v43  ;;  %v971_v51 = vpop.f32.mrb[10].mxu0 }
  0xf4   :  { %v370_v52 = vmul.f32 0.5, %v1154_v48  ;;  %1163 = vtanh.f32 %v345_v46  ;;  %v313_v53 = vadd.f32 %v971_v51, %v120_v35  ;;  %v307_v54 = vpop.f32.mrb[11].mxu0  ;;  %v1080_v55 = vpack.c.bf16 %v385_v44, %v384_v47 }
  0xf5   :  { %v387_v57 = vadd.f32 0.5, %v371_v49  ;;  %1165 = vtanh.f32 %v344_v50  ;;  %v308_v58 = vadd.f32 %v307_v54, %v115_v39 }
  0xf6   :  { %v1156_v59 = vpop.eup %1155  ;;  %v386_v61 = vadd.f32 0.5, %v370_v52  ;;  %v347_v62 = vmul.f32 0.5, %v313_v53  ;;  %1081 = vmatprep.subr.bf16.mxu1 %v1080_v55 }
  0xf7   :  { %v1158_v63 = vpop.eup %1157  ;;  %v373_v3 = vmul.f32 0.5, %v1156_v59  ;;  %v346_v4 = vmul.f32 0.5, %v308_v58  ;;  %v974_v6 = vpop.f32.mrb[12].mxu0  ;;  %1083 = vmatpush3.bf16.msra.mxu1 %v1080_v55 }
  0xf8   :  { %v372_v7 = vmul.f32 0.5, %v1158_v63  ;;  %1167 = vtanh.f32 %v347_v62  ;;  %v323_v8 = vadd.f32 %v974_v6, %v130_v56  ;;  %v317_v9 = vpop.f32.mrb[13].mxu0  ;;  %v1084_v10 = vpack.c.bf16 %v387_v57, %v386_v61  ;;  %v402_v61 = vld [vmem:[%s1533_s3 + $0x10] sm:$0xff]  ;;  %v403_v62 = vld [vmem:[%s1533_s3 + $0x18] sm:$0xff]  ;;  %v404_v63 = vld [vmem:[%s1533_s3 + $0x20] sm:$0xff] }
  0xf9   :  { %v389_v11 = vadd.f32 0.5, %v373_v3  ;;  %1169 = vtanh.f32 %v346_v4  ;;  %v318_v12 = vadd.f32 %v317_v9, %v125_v60  ;;  %v401_v60 = vld [vmem:[%s1533_s3 + $0x8] sm:$0xff]  ;;  %v406_v4 = vld [vmem:[%s1533_s3 + $0x30] sm:$0xff]  ;;  %v407_v6 = vld [vmem:[%s1533_s3 + $0x38] sm:$0xff] }
  0xfa   :  { %v1160_v13 = vpop.eup %1159  ;;  %v388_v14 = vadd.f32 0.5, %v372_v7  ;;  %v349_v15 = vmul.f32 0.5, %v323_v8  ;;  %1085 = vmatprep.subr.bf16.mxu1 %v1084_v10  ;;  %v405_v3 = vld [vmem:[%s1533_s3 + $0x28] sm:$0xff]  ;;  %v408_v7 = vld [vmem:[%s1533_s3 + $0x40] sm:$0xff]  ;;  %v410_v9 = vld [vmem:[%s1533_s3 + $0x50] sm:$0xff] }
  0xfb   :  { %v1162_v16 = vpop.eup %1161  ;;  %v375_v18 = vmul.f32 0.5, %v1160_v13  ;;  %v348_v19 = vmul.f32 0.5, %v318_v12  ;;  %v977_v20 = vpop.f32.mrb[14].mxu0  ;;  %1087 = vmatpush3.bf16.msra.mxu1 %v1084_v10  ;;  %v409_v8 = vld [vmem:[%s1533_s3 + $0x48] sm:$0xff]  ;;  %v411_v10 = vld [vmem:[%s1533_s3 + $0x58] sm:$0xff]  ;;  %v414_v13 = vld [vmem:[%s1533_s3 + $0x70] sm:$0xff] }
  0xfc   :  { %v374_v22 = vmul.f32 0.5, %v1162_v16  ;;  %1171 = vtanh.f32 %v349_v15  ;;  %v333_v23 = vadd.f32 %v977_v20, %v140_v17  ;;  %v327_v24 = vpop.f32.mrb[15].mxu0  ;;  %v1088_v25 = vpack.c.bf16 %v389_v11, %v388_v14  ;;  %v412_v11 = vld [vmem:[%s1533_s3 + $0x60] sm:$0xff]  ;;  %v413_v12 = vld [vmem:[%s1533_s3 + $0x68] sm:$0xff]  ;;  %v415_v14 = vld [vmem:[%s1533_s3 + $0x78] sm:$0xff]  ;;  %v440_v16 = vpop.permute.xlu1 %439 }
  0xfd   :  { %v391_v26 = vadd.f32 0.5, %v375_v18  ;;  %1173 = vtanh.f32 %v348_v19  ;;  %v328_v27 = vadd.f32 %v327_v24, %v135_v21  ;;  %v721_v15 = vld [vmem:[%s1534_s5] sm:$0xff]  ;;  %v435_v17 = vpop.permute.xlu0 %434 }
  0xfe   :  { %v1164_v28 = vpop.eup %1163  ;;  %v390_v29 = vadd.f32 0.5, %v374_v22  ;;  %v351_v30 = vmul.f32 0.5, %v333_v23  ;;  %1089 = vmatprep.subr.bf16.mxu1 %v1088_v25  ;;  %1066 = vmatprep.mubr.f32.mxu0 %v721_v15 }
  0xff   :  { %v1166_v31 = vpop.eup %1165  ;;  %v377_v32 = vmul.f32 0.5, %v1164_v28  ;;  %v350_v33 = vmul.f32 0.5, %v328_v27  ;;  %1091 = vmatpush3.bf16.msra.mxu1 %v1088_v25 }
 0x100   :  { %v376_v34 = vmul.f32 0.5, %v1166_v31  ;;  %1175 = vtanh.f32 %v351_v30  ;;  %v1092_v35 = vpack.c.bf16 %v391_v26, %v390_v29  ;;  %v450_v18 = vpop.permute.xlu1 %449 }
 0x101   :  { %v393_v36 = vadd.f32 0.5, %v377_v32  ;;  %1177 = vtanh.f32 %v350_v33  ;;  %v445_v19 = vpop.permute.xlu0 %444 }
 0x102   :  { %v1168_v37 = vpop.eup %1167  ;;  %v392_v38 = vadd.f32 0.5, %v376_v34  ;;  %1093 = vmatprep.subr.bf16.mxu1 %v1092_v35 }
 0x103   :  { %v1170_v39 = vpop.eup %1169  ;;  %v379_v40 = vmul.f32 0.5, %v1168_v37  ;;  %1095 = vmatpush3.bf16.msra.mxu1 %v1092_v35 }
 0x104   :  { %v378_v41 = vmul.f32 0.5, %v1170_v39  ;;  %v1096_v42 = vpack.c.bf16 %v393_v36, %v392_v38  ;;  %v460_v20 = vpop.permute.xlu1 %459 }
 0x105   :  { %v395_v43 = vadd.f32 0.5, %v379_v40  ;;  %v455_v21 = vpop.permute.xlu0 %454 }
 0x106   :  { %v1172_v44 = vpop.eup %1171  ;;  %v394_v45 = vadd.f32 0.5, %v378_v41  ;;  %1097 = vmatprep.subr.bf16.mxu1 %v1096_v42 }
 0x107   :  { %v1174_v46 = vpop.eup %1173  ;;  %v381_v47 = vmul.f32 0.5, %v1172_v44  ;;  %1099 = vmatpush3.bf16.msra.mxu1 %v1096_v42 }
 0x108   :  { %v380_v48 = vmul.f32 0.5, %v1174_v46  ;;  %v1100_v49 = vpack.c.bf16 %v395_v43, %v394_v45  ;;  %v470_v27 = vpop.permute.xlu1 %469 }
 0x109   :  { %v397_v50 = vadd.f32 0.5, %v381_v47  ;;  %v465_v30 = vpop.permute.xlu0 %464 }
 0x10a   :  { %v1176_v51 = vpop.eup %1175  ;;  %v396_v52 = vadd.f32 0.5, %v380_v48  ;;  %1101 = vmatprep.subr.bf16.mxu1 %v1100_v49 }
 0x10b   :  { %v1178_v53 = vpop.eup %1177  ;;  %v383_v54 = vmul.f32 0.5, %v1176_v51  ;;  %1103 = vmatpush3.bf16.msra.mxu1 %v1100_v49 }
 0x10c   :  { %v382_v55 = vmul.f32 0.5, %v1178_v53  ;;  %v1104_v56 = vpack.c.bf16 %v397_v50, %v396_v52  ;;  %v480_v39 = vpop.permute.xlu1 %479 }
 0x10d   :  { %v399_v57 = vadd.f32 0.5, %v383_v54  ;;  %v475_v41 = vpop.permute.xlu0 %474 }
 0x10e   :  { %v398_v58 = vadd.f32 0.5, %v382_v55  ;;  %1105 = vmatprep.subr.bf16.mxu1 %v1104_v56 }
 0x10f   :  { %1107 = vmatpush3.bf16.msra.mxu1 %v1104_v56 }
 0x110   :  { %v1108_v59 = vpack.c.bf16 %v399_v57, %v398_v58  ;;  %v490_v51 = vpop.permute.xlu1 %489 }
 0x111   :  { %v485_v55 = vpop.permute.xlu0 %484 }
 0x112   :  { %1109 = vmatprep.subr.bf16.mxu1 %v1108_v59 }
 0x113   :  { %1111 = vmatpush3.bf16.msra.mxu1 %v1108_v59 }
 0x116   :  { %1011 = vmatmul.mubr.f32.vlgmr.msra.gmra.mrb[0].mxu1 %v401_v60 }
 0x117   :  { %1013 = vmatprep.mubr.f32.mxu1 %v402_v61 }
 0x11a   :  { %1014 = vmatmul.mubr.f32.gmra.mrb[2].mxu1 %v403_v62 }
 0x11b   :  { %1016 = vmatprep.mubr.f32.mxu1 %v404_v63 }
 0x11e   :  { %1017 = vmatmul.mubr.f32.gmra.mrb[4].mxu1 %v405_v3 }
 0x11f   :  { %1019 = vmatprep.mubr.f32.mxu1 %v406_v4 }
 0x122   :  { %1020 = vmatmul.mubr.f32.gmra.mrb[6].mxu1 %v407_v6 }
 0x123   :  { %1022 = vmatprep.mubr.f32.mxu1 %v408_v7 }
 0x126   :  { %1023 = vmatmul.mubr.f32.gmra.mrb[8].mxu1 %v409_v8 }
 0x127   :  { %1025 = vmatprep.mubr.f32.mxu1 %v410_v9 }
 0x12a   :  { %1026 = vmatmul.mubr.f32.gmra.mrb[10].mxu1 %v411_v10 }
 0x12b   :  { %1028 = vmatprep.mubr.f32.mxu1 %v412_v11 }
 0x12e   :  { %1029 = vmatmul.mubr.f32.gmra.mrb[12].mxu1 %v413_v12  ;;  %v500_v12 = vpop.permute.xlu1 %499 }
 0x12f   :  { %1031 = vmatprep.mubr.f32.mxu1 %v414_v13 }
 0x132   :  { %1032 = vmatmul.mubr.f32.gmra.mrb[14].mxu1 %v415_v14 }
 0x1e9   :  { %v1012_v22 = vpop.f32.mrb[0].mxu1 }
 0x1ea   :  { %v584_v23 = vadd.f32 %v1012_v22, %v440_v16  ;;  %v578_v24 = vpop.f32.mrb[1].mxu1  ;;  %v495_v16 = vpop.permute.xlu0 %494 }
 0x1eb   :  { %v579_v25 = vadd.f32 %v578_v24, %v435_v17 }
 0x1ec   :  { %v658_v26 = vmul.f32 0.5, %v584_v23 }
 0x1ed   :  { %v657_v28 = vmul.f32 0.5, %v579_v25  ;;  %v1015_v29 = vpop.f32.mrb[2].mxu1 }
 0x1ee   :  { %1179 = vtanh.f32 %v658_v26  ;;  %v594_v31 = vadd.f32 %v1015_v29, %v450_v18  ;;  %v588_v32 = vpop.f32.mrb[3].mxu1 }
 0x1ef   :  { %1181 = vtanh.f32 %v657_v28  ;;  %v589_v33 = vadd.f32 %v588_v32, %v445_v19 }
 0x1f0   :  { %v660_v34 = vmul.f32 0.5, %v594_v31 }
 0x1f1   :  { %v659_v35 = vmul.f32 0.5, %v589_v33  ;;  %v1018_v36 = vpop.f32.mrb[4].mxu1  ;;  %v510_v33 = vpop.permute.xlu1 %509 }
 0x1f2   :  { %1183 = vtanh.f32 %v660_v34  ;;  %v604_v37 = vadd.f32 %v1018_v36, %v460_v20  ;;  %v598_v38 = vpop.f32.mrb[5].mxu1 }
 0x1f3   :  { %1185 = vtanh.f32 %v659_v35  ;;  %v599_v40 = vadd.f32 %v598_v38, %v455_v21 }
 0x1f4   :  { %v662_v42 = vmul.f32 0.5, %v604_v37  ;;  %v505_v37 = vpop.permute.xlu0 %504 }
 0x1f5   :  { %v661_v43 = vmul.f32 0.5, %v599_v40  ;;  %v1021_v44 = vpop.f32.mrb[6].mxu1 }
 0x1f6   :  { %1187 = vtanh.f32 %v662_v42  ;;  %v614_v45 = vadd.f32 %v1021_v44, %v470_v27  ;;  %v608_v46 = vpop.f32.mrb[7].mxu1 }
 0x1f7   :  { %1189 = vtanh.f32 %v661_v43  ;;  %v609_v47 = vadd.f32 %v608_v46, %v465_v30 }
 0x1f8   :  { %v1180_v48 = vpop.eup %1179  ;;  %v664_v49 = vmul.f32 0.5, %v614_v45 }
 0x1f9   :  { %v1182_v50 = vpop.eup %1181  ;;  %v690_v52 = vmul.f32 0.5, %v1180_v48  ;;  %v663_v53 = vmul.f32 0.5, %v609_v47  ;;  %v1024_v54 = vpop.f32.mrb[8].mxu1 }
 0x1fa   :  { %v689_v56 = vmul.f32 0.5, %v1182_v50  ;;  %1191 = vtanh.f32 %v664_v49  ;;  %v624_v57 = vadd.f32 %v1024_v54, %v480_v39  ;;  %v618_v58 = vpop.f32.mrb[9].mxu1 }
 0x1fb   :  { %v706_v59 = vadd.f32 0.5, %v690_v52  ;;  %1193 = vtanh.f32 %v663_v53  ;;  %v619_v60 = vadd.f32 %v618_v58, %v475_v41 }
 0x1fc   :  { %v1184_v61 = vpop.eup %1183  ;;  %v705_v62 = vadd.f32 0.5, %v689_v56  ;;  %v666_v63 = vmul.f32 0.5, %v624_v57 }
 0x1fd   :  { %v1186_v3 = vpop.eup %1185  ;;  %v692_v4 = vmul.f32 0.5, %v1184_v61  ;;  %v665_v6 = vmul.f32 0.5, %v619_v60  ;;  %v1027_v7 = vpop.f32.mrb[10].mxu1 }
 0x1fe   :  { %v691_v8 = vmul.f32 0.5, %v1186_v3  ;;  %1195 = vtanh.f32 %v666_v63  ;;  %v634_v9 = vadd.f32 %v1027_v7, %v490_v51  ;;  %v628_v10 = vpop.f32.mrb[11].mxu1  ;;  %v1112_v11 = vpack.c.bf16 %v706_v59, %v705_v62 }
 0x1ff   :  { %v708_v13 = vadd.f32 0.5, %v692_v4  ;;  %1197 = vtanh.f32 %v665_v6  ;;  %v629_v14 = vadd.f32 %v628_v10, %v485_v55 }
 0x200   :  { %v1188_v15 = vpop.eup %1187  ;;  %v707_v17 = vadd.f32 0.5, %v691_v8  ;;  %v668_v18 = vmul.f32 0.5, %v634_v9  ;;  %1113 = vmatprep.subr.bf16.mxu0 %v1112_v11 }
 0x201   :  { %v1190_v19 = vpop.eup %1189  ;;  %v694_v20 = vmul.f32 0.5, %v1188_v15  ;;  %v667_v21 = vmul.f32 0.5, %v629_v14  ;;  %v1030_v22 = vpop.f32.mrb[12].mxu1  ;;  %1115 = vmatpush3.bf16.msra.mxu0 %v1112_v11 }
 0x202   :  { %v693_v23 = vmul.f32 0.5, %v1190_v19  ;;  %1199 = vtanh.f32 %v668_v18  ;;  %v644_v24 = vadd.f32 %v1030_v22, %v500_v12  ;;  %v638_v25 = vpop.f32.mrb[13].mxu1  ;;  %v1116_v26 = vpack.c.bf16 %v708_v13, %v707_v17  ;;  %v723_v17 = vld [vmem:[%s1534_s5 + $0x10] sm:$0xff]  ;;  %v724_v18 = vld [vmem:[%s1534_s5 + $0x18] sm:$0xff]  ;;  %v737_v19 = vpop.permute.xlu1 %736 }
 0x203   :  { %v710_v27 = vadd.f32 0.5, %v694_v20  ;;  %1201 = vtanh.f32 %v667_v21  ;;  %v639_v28 = vadd.f32 %v638_v25, %v495_v16  ;;  %v722_v16 = vld [vmem:[%s1534_s5 + $0x8] sm:$0xff]  ;;  %v732_v20 = vpop.permute.xlu0 %731 }
 0x204   :  { %v1192_v29 = vpop.eup %1191  ;;  %v709_v30 = vadd.f32 0.5, %v693_v23  ;;  %v670_v31 = vmul.f32 0.5, %v644_v24  ;;  %1117 = vmatprep.subr.bf16.mxu0 %v1116_v26 }
 0x205   :  { %v1194_v32 = vpop.eup %1193  ;;  %v696_v34 = vmul.f32 0.5, %v1192_v29  ;;  %v669_v35 = vmul.f32 0.5, %v639_v28  ;;  %v1033_v36 = vpop.f32.mrb[14].mxu1  ;;  %1119 = vmatpush3.bf16.msra.mxu0 %v1116_v26 }
 0x206   :  { %v695_v38 = vmul.f32 0.5, %v1194_v32  ;;  %1203 = vtanh.f32 %v670_v31  ;;  %v654_v39 = vadd.f32 %v1033_v36, %v510_v33  ;;  %v648_v40 = vpop.f32.mrb[15].mxu1  ;;  %v1120_v41 = vpack.c.bf16 %v710_v27, %v709_v30  ;;  %v747_v26 = vpop.permute.xlu1 %746 }
 0x207   :  { %v712_v42 = vadd.f32 0.5, %v696_v34  ;;  %1205 = vtanh.f32 %v669_v35  ;;  %v649_v43 = vadd.f32 %v648_v40, %v505_v37  ;;  %v742_v30 = vpop.permute.xlu0 %741 }
 0x208   :  { %v1196_v44 = vpop.eup %1195  ;;  %v711_v45 = vadd.f32 0.5, %v695_v38  ;;  %v672_v46 = vmul.f32 0.5, %v654_v39  ;;  %1121 = vmatprep.subr.bf16.mxu0 %v1120_v41 }
 0x209   :  { %v1198_v47 = vpop.eup %1197  ;;  %v698_v48 = vmul.f32 0.5, %v1196_v44  ;;  %v671_v49 = vmul.f32 0.5, %v649_v43  ;;  %1123 = vmatpush3.bf16.msra.mxu0 %v1120_v41 }
 0x20a   :  { %v697_v50 = vmul.f32 0.5, %v1198_v47  ;;  %1207 = vtanh.f32 %v672_v46  ;;  %v1124_v51 = vpack.c.bf16 %v712_v42, %v711_v45 }
 0x20b   :  { %v714_v52 = vadd.f32 0.5, %v698_v48  ;;  %1209 = vtanh.f32 %v671_v49 }
 0x20c   :  { %v1200_v53 = vpop.eup %1199  ;;  %v713_v54 = vadd.f32 0.5, %v697_v50  ;;  %1125 = vmatprep.subr.bf16.mxu0 %v1124_v51 }
 0x20d   :  { %v1202_v55 = vpop.eup %1201  ;;  %v700_v56 = vmul.f32 0.5, %v1200_v53  ;;  %1127 = vmatpush3.bf16.msra.mxu0 %v1124_v51 }
 0x20e   :  { %v699_v57 = vmul.f32 0.5, %v1202_v55  ;;  %v1128_v58 = vpack.c.bf16 %v714_v52, %v713_v54 }
 0x20f   :  { %v716_v59 = vadd.f32 0.5, %v700_v56 }
 0x210   :  { %v1204_v60 = vpop.eup %1203  ;;  %v715_v61 = vadd.f32 0.5, %v699_v57  ;;  %1129 = vmatprep.subr.bf16.mxu0 %v1128_v58 }
 0x211   :  { %v1206_v62 = vpop.eup %1205  ;;  %v702_v63 = vmul.f32 0.5, %v1204_v60  ;;  %1131 = vmatpush3.bf16.msra.mxu0 %v1128_v58 }
 0x212   :  { %v701_v3 = vmul.f32 0.5, %v1206_v62  ;;  %v1132_v4 = vpack.c.bf16 %v716_v59, %v715_v61 }
 0x213   :  { %v718_v6 = vadd.f32 0.5, %v702_v63 }
 0x214   :  { %v1208_v7 = vpop.eup %1207  ;;  %v717_v8 = vadd.f32 0.5, %v701_v3  ;;  %1133 = vmatprep.subr.bf16.mxu0 %v1132_v4 }
 0x215   :  { %v1210_v9 = vpop.eup %1209  ;;  %v704_v10 = vmul.f32 0.5, %v1208_v7  ;;  %1135 = vmatpush3.bf16.msra.mxu0 %v1132_v4 }
 0x216   :  { %v703_v11 = vmul.f32 0.5, %v1210_v9  ;;  %v1136_v12 = vpack.c.bf16 %v718_v6, %v717_v8 }
 0x217   :  { %v720_v13 = vadd.f32 0.5, %v704_v10 }
 0x218   :  { %v719_v14 = vadd.f32 0.5, %v703_v11  ;;  %1137 = vmatprep.subr.bf16.mxu0 %v1136_v12 }
 0x219   :  { %1139 = vmatpush3.bf16.msra.mxu0 %v1136_v12 }
 0x21a   :  { %v1140_v15 = vpack.c.bf16 %v720_v13, %v719_v14 }
 0x21c   :  { %1141 = vmatprep.subr.bf16.mxu0 %v1140_v15 }
 0x21d   :  { %1143 = vmatpush3.bf16.msra.mxu0 %v1140_v15 }
 0x220   :  { %1067 = vmatmul.mubr.f32.vlgmr.msra.gmra.mrb[16].mxu0 %v722_v16 }
 0x221   :  { %1069 = vmatprep.mubr.f32.mxu0 %v723_v17 }
 0x224   :  { %1070 = vmatmul.mubr.f32.gmra.mrb[18].mxu0 %v724_v18 }
 0x2f3   :  { %v1068_v21 = vpop.f32.mrb[16].mxu0 }
 0x2f4   :  { %v821_v22 = vadd.f32 %v1068_v21, %v737_v19  ;;  %v815_v23 = vpop.f32.mrb[17].mxu0 }
 0x2f5   :  { %v816_v24 = vadd.f32 %v815_v23, %v732_v20 }
 0x2f6   :  { %v839_v25 = vsel %vm835_vm1, -200.0, %v821_v22 }
 0x2f7   :  { %v847_v27 = vsel %vm843_vm2, 200.0, %v839_v25  ;;  %v838_v28 = vsel %vm834_vm3, -200.0, %v816_v24  ;;  %v1071_v29 = vpop.f32.mrb[18].mxu0 }
 0x2f8   :  { %851 = vst [vmem:[%s1535_s7 + $0x8] sm:$0xff] %v847_v27  ;;  %v846_v31 = vsel %vm842_vm4, 200.0, %v838_v28  ;;  %v831_v1 = vadd.f32 %v1071_v29, %v747_v26  ;;  %v825_v32 = vpop.f32.mrb[19].mxu0 }
 0x2f9   :  { %850 = vst [vmem:[%s1535_s7] sm:$0xff] %v846_v31  ;;  %v826_v0 = vadd.f32 %v825_v32, %v742_v30 }
 0x2fa   :  { %v841_v33 = vsel %vm837_vm5, -200.0, %v831_v1 }
 0x2fb   :  { %v849_v34 = vsel %vm845_vm6, 200.0, %v841_v33  ;;  %v840_v35 = vsel %vm836_vm7, -200.0, %v826_v0 }
 0x2fc   :  { %853 = vst [vmem:[%s1535_s7 + $0x18] sm:$0xff] %v849_v34  ;;  %v848_v36 = vsel %vm844_vm8, 200.0, %v840_v35 }
 0x2fd   :  { %852 = vst [vmem:[%s1535_s7 + $0x10] sm:$0xff] %v848_v36 }

</bundles_post_ra>
